<compile_context>
chip_gen: v7x
topology: tpu7x:2x2x1
jax: 0.10.0
libtpu: 0.0.40
codegen_flags: <defaults>
</compile_context>

<pallas_src>
import jax
import jax.numpy as jnp
from jax.experimental import pallas as pl
from jax.experimental.pallas import tpu as pltpu

_EPS = 1e-12  # F.normalize default eps


def _round_up(x, m):
    return ((x + m - 1) // m) * m


def _cosine_matmul_kernel(img_ref, con_ref, out_ref):
    # img_ref: [TN, D_pad] pre-normalized (inv_temp folded in); con_ref: [TC, D_pad]
    # pre-normalized.  Contract on the last dims directly (no transpose), f32 acc.
    out_ref[...] = jax.lax.dot_general(
        img_ref[...], con_ref[...],
        dimension_numbers=(((1,), (1,)), ((), ())),
        preferred_element_type=jnp.float32,
    ).astype(out_ref.dtype)


def _cosine_matmul_ksplit_kernel(img_ref, con_ref, out_ref, acc_ref):
    # K-split variant: grid axis 2 walks the contraction dim, f32 VMEM accumulator.
    @pl.when(pl.program_id(2) == 0)
    def _():
        acc_ref[...] = jnp.zeros_like(acc_ref)

    acc_ref[...] += jax.lax.dot_general(
        img_ref[...], con_ref[...],
        dimension_numbers=(((1,), (1,)), ((), ())),
        preferred_element_type=jnp.float32,
    )

    @pl.when(pl.program_id(2) == pl.num_programs(2) - 1)
    def _():
        out_ref[...] = acc_ref[...].astype(out_ref.dtype)


def _normalize_rows_pad(x, row_scale, pad_rows, pad_cols, dtype):
    """(x / max(||x||_2, eps)) * row_scale, cast to `dtype`, zero-padded.

    One fused XLA pass (square/sum/rsqrt/mul/cast/pad).  Zero rows are clamped by
    eps^2 (representable in f32) so no NaN/Inf; zero D-padding does not change
    norms or dot products; padded rows produce zeros that are sliced off.
    """
    xf = x.astype(jnp.float32)
    ss = jnp.sum(xf * xf, axis=-1, keepdims=True)
    xn = (xf * (row_scale * jax.lax.rsqrt(jnp.maximum(ss, _EPS * _EPS)))).astype(dtype)
    if pad_rows or pad_cols:
        xn = jnp.pad(xn, ((0, pad_rows), (0, pad_cols)))
    return xn


def cosine_classifier(img, concept, temp=0.05, scale=True, *,
                      tn=512, tc=512, tk=1024,
                      mxu_dtype=jnp.bfloat16, out_dtype=jnp.float32):
    """img: [N, D], concept: [C, D] -> pred: [N, C] (out_dtype, default float32).

    mxu_dtype=jnp.float32 is the precision knob (3-8x MXU cost) if the ~0.4%
    relative bf16 operand error on the 1/temp-scaled logits matters downstream.
    """
    N, D = img.shape
    C, Dc = concept.shape
    assert D == Dc, "feature dims must match"

    inv_temp = (1.0 / temp) if scale else 1.0
    op_isize = jnp.dtype(mxu_dtype).itemsize
    out_isize = jnp.dtype(out_dtype).itemsize

    # ---- tile / padding geometry -------------------------------------------
    # Contraction dim: lane-aligned; split over a third ("arbitrary") grid axis
    # when large so per-step VMEM stays bounded without shrinking TN/TC.
    if _round_up(D, 128) > 2 * tk:
        TK = tk
        D_pad = _round_up(D, TK)
        k_tiles = D_pad // TK
    else:
        D_pad = _round_up(D, 128)
        TK = D_pad
        k_tiles = 1

    # C tile: keep the whole normalized concept matrix VMEM-resident when it fits
    # (fewest HBM bytes + widest lane-dense output store); otherwise tile C.
    C_pad128 = _round_up(C, 128)
    con_resident = (C_pad128 * D_pad * op_isize) <= (8 << 20)
    if con_resident and k_tiles == 1:
        TC = C_pad128
    else:
        TC = min(tc, C_pad128)
    C_pad = _round_up(C, TC)
    c_tiles = C_pad // TC

    # N tile: multiple of 8 sublanes.  If the grid would be 1x1, halve TN so both
    # v7x TensorCores get a "parallel" tile (harmless on 1-TC chips).
    TN = min(tn, _round_up(N, 8))
    if c_tiles == 1 and _round_up(N, TN) // TN == 1 and TN >= 16 and TN % 16 == 0:
        TN //= 2
    N_pad = _round_up(N, TN)
    n_tiles = N_pad // TN

    # ---- hoisted, fused normalization + cast + pad --------------------------
    img_p = _normalize_rows_pad(img, inv_temp, N_pad - N, D_pad - D, mxu_dtype)
    con_p = _normalize_rows_pad(concept, 1.0, C_pad - C, D_pad - D, mxu_dtype)

    # ---- VMEM budget ---------------------------------------------------------
    vmem_need = 2 * (TN * TK * op_isize + TC * TK * op_isize + TN * TC * out_isize)
    if k_tiles > 1:
        vmem_need += TN * TC * 4  # f32 accumulator scratch
    try:
        vmem_cap = int(pltpu.get_tpu_info().vmem_capacity_bytes)
    except Exception:
        vmem_cap = 64 << 20  # conservative (v7x-sized) fallback
    vmem_limit = int(min(max(vmem_need + (2 << 20), 16 << 20), (3 * vmem_cap) // 4))

    # ---- grid / specs --------------------------------------------------------
    if k_tiles == 1:
        kernel = _cosine_matmul_kernel
        grid = (n_tiles, c_tiles)
        in_specs = [
            pl.BlockSpec((TN, D_pad), lambda i, j: (i, 0)),
            pl.BlockSpec((TC, D_pad), lambda i, j: (j, 0)),
        ]
        out_specs = pl.BlockSpec((TN, TC), lambda i, j: (i, j))
        scratch_shapes = []
        dim_sem = ("parallel", "parallel")
    else:
        kernel = _cosine_matmul_ksplit_kernel
        grid = (n_tiles, c_tiles, k_tiles)
        in_specs = [
            pl.BlockSpec((TN, TK), lambda i, j, k: (i, k)),
            pl.BlockSpec((TC, TK), lambda i, j, k: (j, k)),
        ]
        out_specs = pl.BlockSpec((TN, TC), lambda i, j, k: (i, j))
        scratch_shapes = [pltpu.VMEM((TN, TC), jnp.float32)]
        dim_sem = ("parallel", "parallel", "arbitrary")

    out = pl.pallas_call(
        kernel,
        out_shape=jax.ShapeDtypeStruct((N_pad, C_pad), out_dtype),
        grid_spec=pltpu.PrefetchScalarGridSpec(
            num_scalar_prefetch=0,
            grid=grid,
            in_specs=in_specs,
            out_specs=out_specs,
            scratch_shapes=scratch_shapes,
        ),
        compiler_params=pltpu.CompilerParams(
            dimension_semantics=dim_sem,
            vmem_limit_bytes=vmem_limit,
        ),
    )(img_p, con_p)

    return out[:N, :C]


def _reference(img, concept, temp=0.05, scale=True):
    img_n = img / jnp.maximum(jnp.linalg.norm(img, axis=-1, keepdims=True), _EPS)
    con_n = concept / jnp.maximum(jnp.linalg.norm(concept, axis=-1, keepdims=True), _EPS)
    pred = jnp.einsum("nd,cd->nc", img_n, con_n, precision=jax.lax.Precision.HIGHEST)
    if scale:
        pred = pred / temp
    return pred


if __name__ == "__main__":
    key = jax.random.PRNGKey(0)
    k_img, k_con = jax.random.split(key)

    # Small shapes: N=16 image embeddings, C=8 concepts, D=32 hidden.
    N, C, D = 16, 8, 32
    img = jax.random.normal(k_img, (N, D), dtype=jnp.float32)
    concept = jax.random.normal(k_con, (C, D), dtype=jnp.float32)

    pred = cosine_classifier(img, concept, temp=0.05, scale=True)
    pred = jax.block_until_ready(pred)

    ref = _reference(img, concept, temp=0.05, scale=True)
    assert pred.shape == (N, C)
    # bf16 MXU operands (f32 accumulation) + /0.05 scaling -> ~1e-1-level abs error.
    assert jnp.allclose(pred, ref, atol=0.15, rtol=0.02), "mismatch vs reference"

    print("KERNEL_OK")
</pallas_src>

<mosaic_0001>
module attributes {stable_mosaic.version = 11 : i64} {
  func.func @_cosine_matmul_kernel(%arg0: i32, %arg1: i32, %arg2: memref<8x128xbf16, #tpu.memory_space<vmem>>, %arg3: memref<128x128xbf16, #tpu.memory_space<vmem>>, %arg4: memref<8x128xf32, #tpu.memory_space<vmem>>) attributes {dimension_semantics = [#tpu.dimension_semantics<parallel>, #tpu.dimension_semantics<parallel>], iteration_bounds = array<i64: 2, 1>, scalar_prefetch = 0 : i64, scratch_operands = 0 : i64, tpu.core_type = #tpu.core_type<tc>, window_params = [{transform_indices = @transform_0, window_bounds = array<i64: 8, 128>}, {transform_indices = @transform_1, window_bounds = array<i64: 128, 128>}, {transform_indices = @transform_2, window_bounds = array<i64: 8, 128>}]} {
    %c0 = arith.constant 0 : index
    %c0_0 = arith.constant 0 : index
    %0 = vector.load %arg2[%c0, %c0_0] : memref<8x128xbf16, #tpu.memory_space<vmem>>, vector<8x128xbf16>
    %c0_1 = arith.constant 0 : index
    %c0_2 = arith.constant 0 : index
    %1 = vector.load %arg3[%c0_1, %c0_2] : memref<128x128xbf16, #tpu.memory_space<vmem>>, vector<128x128xbf16>
    %cst = arith.constant dense<0.000000e+00> : vector<8x128xf32>
    %2 = tpu.matmul %0, %1, %cst {dimension_numbers = #tpu.dot_dimension_numbers<[1], [1], [0], [0], [0, 0, 1, 0], [], []>} : vector<8x128xbf16>, vector<128x128xbf16>, vector<8x128xf32> -> vector<8x128xf32>
    %c0_3 = arith.constant 0 : index
    %c0_4 = arith.constant 0 : index
    %3 = vector.load %arg4[%c0_3, %c0_4] : memref<8x128xf32, #tpu.memory_space<vmem>>, vector<8x128xf32>
    tpu.vector_store %arg4[%c0_3, %c0_4], %2 {strides = array<i32>} : memref<8x128xf32, #tpu.memory_space<vmem>>, vector<8x128xf32>,
    return
  }
  func.func @transform_0(%arg0: i32, %arg1: i32) -> (i32, i32) {
    %c0_i32 = arith.constant 0 : i32
    %c0_i32_0 = arith.constant 0 : i32
    return %arg0, %c0_i32 : i32, i32
  }
  func.func @transform_1(%arg0: i32, %arg1: i32) -> (i32, i32) {
    %c0_i32 = arith.constant 0 : i32
    %c0_i32_0 = arith.constant 0 : i32
    return %arg1, %c0_i32 : i32, i32
  }
  func.func @transform_2(%arg0: i32, %arg1: i32) -> (i32, i32) {
    %c0_i32 = arith.constant 0 : i32
    return %arg0, %arg1 : i32, i32
  }
}

</mosaic_0001>

<bundles_post_ra>
// kernel: tpu_custom_call.1
= control target key start
LH: loop header
LB: loop body
LE: loop exit
PB: predicated region body
PF: predicated region fallthrough
CT: control target
= control target key end

     0   :  { %7 = vsyncpa [#allocation3], 0  ;;  %s933_s0 = inlined_call_operand.hbm [shape: bf16[16,128], index: 0, kind: input, shape index: {}]   ;;  %s934_s1 = inlined_call_operand.hbm [shape: bf16[128,128], index: 1, kind: input, shape index: {}]   ;;  %s935_s2 = inlined_call_operand.hbm [shape: f32[16,128], index: 2, kind: output, shape index: {}]  }
   0x1   :  { %9 = vsyncpa [#allocation3 + $0x1], 0 }
   0x2   :  { %10 = vsyncpa [#allocation6], 0 }
   0x3   :  { %11 = vsyncpa [#allocation4], 0 }
   0x4   :  { %13 = vsyncpa [#allocation4 + $0x1], 0  ;;  %s715_s9 = smov 0   ;;  %s717_s10 = smov 0  }
   0x5   :  { %s719_s11 = smov 0   ;;  %s721_s12 = smov 0  }
   0x6   :  { %s723_s13 = smov 0   ;;  %s725_s14 = smov 0  }
   0x7 LB: > { %s410_s15 = sadd.s32 4294967295, %s691_s14   ;;  %s411_s16 = sadd.s32 4294967294, %s691_s14   ;;  %s691_s14 = sphi %s725_s14, %s19_s14   ;;  %s687_s13 = sphi %s723_s13, %s959_s13   ;;  %s683_s12 = sphi %s721_s12, %s958_s12   ;;  %s679_s11 = sphi %s719_s11, %s957_s11   ;;  %s675_s10 = sphi %s717_s10, %s956_s10   ;;  %s671_s9 = sphi %s715_s9, %s955_s9  }
   0x8   : > { %p51_p0 = scmp.ne.s32.totalorder %s675_s10, %s671_s9  ;;  %p749_p1 = scmp.eq.s32.totalorder %s410_s15, 0 }
   0x9   : > { %p753_p2 = scmp.eq.s32.totalorder %s410_s15, 1  ;;  %p109_p3 = scmp.eq.s32.totalorder %s411_s16, 1 }
   0xa   : > { %s940_s17 = scalar_select %p749_p1, 1, 0 }
   0xb   : > { %s941_s18 = scalar_select %p753_p2, 1, 0 }
   0xc   : > { %p759_p4 = por %p749_p1, %p51_p0  ;;  %p412_p5 = scmp.ge.s32.totalorder %s691_s14, 1 }
   0xd   : > { %p764_p6 = por %p109_p3, %p51_p0  ;;  %p116_p7 = scmp.lt.s32.totalorder %s691_s14, 3 }
   0xe   : > { %s942_s19 = scalar_select %p759_p4, 1, 0 }
   0xf   : > { %s943_s20 = scalar_select %p764_p6, 1, 0 }
  0x10   : > { %p769_p8 = pnand %p412_p5, %p116_p7  ;;  %s693_s22 = smov [#allocation5]  }
  0x11   : > { %s131_s23 = sshll.u32 %s693_s22, 4  ;;  %s31_s25 = sadd.s32 1, %s687_s13  ;;  %s132_s23 = int_to_ptr.vmem [resolvable:$true] %s131_s23 }
  0x12   : > { %s944_s21 = scalar_select %p769_p8, 1, 0 }
  0x13   : > { %p470_p9 = pneg %p769_p8  ;;  %s547_s28 = scalar_lea.hbm %s934_s1, 1024 }
  0x14   : > { %p548_p12 = scmp.ne.s32.totalorder %s934_s1, %s547_s28  ;;  %p554_p5 = scmp.lt.u32.totalorder %s547_s28, %s934_s1 }
  0x15   : > { %p778_p11 = pnand %p470_p9, %p749_p1 }
  0x17   : > { %p549_p13 = pneg %p778_p11 }
  0x19   : > { %p550_p0 = pnand %p549_p13, %p548_p12 }
  0x1b   : > { %p551_p3 = pneg %p550_p0 }
  0x1d   : > { %p556_p7 = pnand %p554_p5, %p551_p3 }
  0x1f   : > { %559 = shalt.err (!%p556_p7)
}
  0x20   : > { %s560_s5 = scalar_lea.vmem %s132_s23, 1024  ;;  %p568_p1 = scmp.lt.s32.totalorder %s132_s23, %s132_s23 }
  0x21   : > { %p561_p9 = scmp.ne.s32.totalorder %s132_s23, %s560_s5  ;;  %p569_p4 = scmp.lt.s32.totalorder %s560_s5, %s560_s5 }
  0x23   : > { %p563_p10 = pnand %p561_p9, %p549_p13  ;;  %p570_p8 = por %p569_p4, %p568_p1 }
  0x25   : > { %p564_p6 = pneg %p563_p10 }
  0x27   : > { %p571_p2 = pnand %p570_p8, %p564_p6 }
  0x29   : > { %574 = shalt.err (!%p571_p2)
}
  0x2a   : > { %s694_s6 = smov 64   ;;  %s695_s7 = smov 4  }
  0x2b   : > { %473 = dma.hbm_to_vmem [thread:$0]  (!%p778_p11), %s934_s1, 1024, %s132_s23, [#allocation6], %s694_s6, %s694_s6, %s695_s7  }
  0x2c   : > { %p33_p1 = scmp.ge.s32.totalorder %s31_s25, 2  ;;  %s38_s16 = sadd.s32 1, %s679_s11 }
  0x2d   : > { %p45_p2 = scmp.ne.s32.totalorder %s679_s11, %s675_s10  ;;  %p46_p4 = scmp.eq.s32.totalorder %s691_s14, 0 }
  0x2e   : > { %s961_s25 = smov (%p33_p1, %s31_s25), 0  ;;  %p947_p8 = scmp.ne.s32.totalorder %s941_s18, 0 }
  0x2f   : > { %p805_p6 = por %p46_p4, %p45_p2  ;;  %s35_s24 = ssub.s32 %s687_s13, %s961_s25 }
  0x30   : > { %p811_p10 = por %p947_p8, %p45_p2  ;;  %p483_p12 = scmp.lt.s32.totalorder %s691_s14, 2 }
  0x31   : > { %p36_p11 = scmp.eq.s32.totalorder %s35_s24, 0  ;;  %s145_s23 = sand.u32 1, %s679_s11  }
  0x32   : > { %s415_s27 = sshll.u32 %s145_s23, 2  ;;  %s416_s29 = sshll.u32 %s687_s13, 6 }
  0x33   : > { %s820_s28 = scalar_select %p36_p11, %s679_s11, %s38_s16  }
  0x34   : > { %s826_s4 = scalar_lea.hbm %s933_s0, %s416_s29  ;;  %s149_s18 = scalar_lea.vmem [#allocation2], %s415_s27 }
  0x35   : > { %s156_s5 = sshll.u32 %s149_s18, 4  ;;  %p832_p13 = pnand %p483_p12, %p805_p6  ;;  %s828_s5 = int_to_ptr.vmem [resolvable:$true] %s156_s5 }
  0x36   : > { %s146_s7 = scalar_lea.sflag [#allocation3], %s145_s23  ;;  %s575_s8 = scalar_lea.hbm %s826_s4, 64 }
  0x37   : > { %p576_p0 = scmp.ne.s32.totalorder %s826_s4, %s575_s8  ;;  %p577_p3 = pneg %p832_p13 }
  0x38   : > { %s580_s24 = scalar_lea.hbm %s933_s0, 128  ;;  %p581_p9 = scmp.lt.u32.totalorder %s826_s4, %s933_s0 }
  0x39   : > { %p578_p5 = pnand %p577_p3, %p576_p0  ;;  %p582_p1 = scmp.lt.u32.totalorder %s580_s24, %s575_s8 }
  0x3a   : > { %p584_p4 = scmp.lt.u32.totalorder %s575_s8, %s826_s4 }
  0x3b   : > { %p579_p7 = pneg %p578_p5  ;;  %p583_p2 = por %p582_p1, %p581_p9 }
  0x3d   : > { %p585_p6 = por %p584_p4, %p583_p2 }
  0x3f   : > { %p586_p8 = pnand %p585_p6, %p579_p7 }
  0x41   : > { %589 = shalt.err (!%p586_p8)
}
  0x42   : > { %s590_s23 = scalar_lea.vmem %s828_s5, 64  ;;  %s696_s29 = smov [#allocation2]  }
  0x43   : > { %p591_p12 = scmp.ne.s32.totalorder %s828_s5, %s590_s23  ;;  %s595_s30 = sshll.u32 %s696_s29, 4  ;;  %s596_s30 = int_to_ptr.vmem [resolvable:$false] %s595_s30 }
  0x44   : > { %s597_s3 = scalar_lea.vmem %s596_s30, 128  ;;  %p598_p5 = scmp.lt.s32.totalorder %s828_s5, %s596_s30 }
  0x45   : > { %p593_p11 = pnand %p591_p12, %p577_p3  ;;  %p599_p9 = scmp.lt.s32.totalorder %s597_s3, %s590_s23 }
  0x47   : > { %p594_p0 = pneg %p593_p11  ;;  %p600_p1 = por %p599_p9, %p598_p5 }
  0x49   : > { %p601_p2 = pnand %p600_p1, %p594_p0 }
  0x4b   : > { %604 = shalt.err (!%p601_p2)
}
  0x4c   : > { %477 = dma.hbm_to_vmem [thread:$0]  (!%p832_p13), %s826_s4, 64, %s828_s5, %s146_s7  }
  0x4d   : > { %p950_p7 = scmp.ne.s32.totalorder %s944_s21, 0 }
  0x4e   : > { %s864_s18 = sand.u32 (!%p950_p7), 1, %s675_s10   ;;  %p951_p3 = scmp.ne.s32.totalorder (!%p950_p7), %s942_s19, 0 }
  0x4f   : > { %165 = sbr.rel (%p950_p7) target bundleno = 382 (0x17e), region = 28  ;;  %s418_s8 = sshll.u32 (!%p950_p7), %s864_s18, 2 }
  0x50   : > { %s168_s15 = scalar_lea.sflag (!%p950_p7), [#allocation3], %s864_s18  ;;  %s868_s16 = scalar_lea.vmem (!%p950_p7), [#allocation2], %s418_s8 }
  0x56   : > { %658 = dma.done.wait (%p951_p3), %s168_s15, 64  }
  0x57   : > { %660 = vsyncadd (%p951_p3), %s168_s15, 4294967232  ;;  %p952_p13 = scmp.ne.s32.totalorder %s940_s17, 0 }
  0x59   : > { %662 = dma.done.wait (%p952_p13), [#allocation6], 1024  }
  0x5a   : > { %664 = vsyncadd (%p952_p13), [#allocation6], 4294966272  ;;  %v697_v0 = vmov 0.0   ;;  %vm698_vm0 = vmmov 0   ;;  %v539_v1 = vld [vmem:[#allocation5] sm:$0xff]   ;;  %v540_v2 = vld [vmem:[#allocation5 + $0x8] sm:$0xff]  }
  0x5b   : > { %442 = vmatprep.subr.bf16.mxu0 %v697_v0  ;;  %458 = vmatprep.mubr.msk.bf16.mxu0 %vm698_vm0, %v697_v0  ;;  %v541_v3 = vld [vmem:[#allocation5 + $0x10] sm:$0xff]   ;;  %v542_v4 = vld [vmem:[#allocation5 + $0x18] sm:$0xff]   ;;  %v543_v5 = vld [vmem:[#allocation5 + $0x20] sm:$0xff]   ;;  %s420_s17 = sshll.u32 %s864_s18, 3  ;;  %s430_s4 = sshll.u32 %s683_s12, 7 }
  0x5c   : > { %443 = vmatpush3.bf16.xpose.msra.mxu0 %v539_v1  ;;  %v544_v6 = vld [vmem:[#allocation5 + $0x28] sm:$0xff]   ;;  %v545_v7 = vld [vmem:[#allocation5 + $0x30] sm:$0xff]   ;;  %v546_v8 = vld [vmem:[#allocation5 + $0x38] sm:$0xff]   ;;  %s195_s19 = scalar_lea.vmem [#allocation7], %s420_s17  ;;  %s886_s7 = scalar_lea.hbm %s935_s2, %s430_s4 }
  0x5d   : > { %444 = vmatprep.subr.bf16.mxu0 %v697_v0  ;;  %v198_v9 = vld [vmem:[%s868_s16] sm:$0xf]  ;;  %s319_s21 = sshll.u32 %s195_s19, 4  ;;  %s305_s24 = scalar_lea.sflag [#allocation4], %s864_s18  ;;  %s881_s21 = int_to_ptr.vmem [resolvable:$true] %s319_s21 }
  0x5e   : > { %s605_s22 = scalar_lea.vmem %s881_s21, 128  ;;  %s699_s12 = smov [#allocation7]  }
  0x5f   : > { %p606_p4 = scmp.ne.s32.totalorder %s881_s21, %s605_s22  ;;  %s609_s27 = sshll.u32 %s699_s12, 4  ;;  %s610_s27 = int_to_ptr.vmem [resolvable:$false] %s609_s27 }
  0x60   : > { %s611_s23 = scalar_lea.vmem %s610_s27, 256  ;;  %p612_p12 = scmp.lt.s32.totalorder %s881_s21, %s610_s27 }
  0x61   : > { %p607_p6 = pnand %p606_p4, %p811_p10  ;;  %p613_p11 = scmp.lt.s32.totalorder %s611_s23, %s605_s22 }
  0x63   : > { %p608_p8 = pneg %p607_p6  ;;  %p614_p0 = por %p613_p11, %p612_p12 }
  0x64   : > { %445 = vmatpush3.bf16.xpose.msra.mxu0 %v540_v2 }
  0x65   : > { %446 = vmatprep.subr.bf16.mxu0 %v697_v0  ;;  %p615_p5 = pnand %p614_p0, %p608_p8 }
  0x6c   : > { %447 = vmatpush3.bf16.xpose.msra.mxu0 %v541_v3 }
  0x6d   : > { %448 = vmatprep.subr.bf16.mxu0 %v697_v0 }
  0x74   : > { %449 = vmatpush3.bf16.xpose.msra.mxu0 %v542_v4 }
  0x75   : > { %450 = vmatprep.subr.bf16.mxu0 %v697_v0 }
  0x7c   : > { %451 = vmatpush3.bf16.xpose.msra.mxu0 %v543_v5 }
  0x7d   : > { %452 = vmatprep.subr.bf16.mxu0 %v697_v0 }
  0x84   : > { %453 = vmatpush3.bf16.xpose.msra.mxu0 %v544_v6 }
  0x85   : > { %454 = vmatprep.subr.bf16.mxu0 %v697_v0 }
  0x8c   : > { %455 = vmatpush3.bf16.xpose.msra.mxu0 %v545_v7 }
  0x8d   : > { %456 = vmatprep.subr.bf16.mxu0 %v697_v0 }
  0x94   : > { %457 = vmatpush3.bf16.xpose.msra.mxu0 %v546_v8 }
  0x9b   : > { %459 = vmatmul.mubr.bf16.vlgmr.msra.gmra.mrb[0].mxu0 %v198_v9 }
 0x16e   : > { %v297_v10 = vpop.f32.mrb[0].mxu0 }
 0x16f   : > { %303 = vst [vmem:[%s195_s19] sm:$0xff] %v297_v10  ;;  %v460_v11 = vpop.f32.mrb[1].mxu0 }
 0x170   : > { %v300_v12 = vpop.f32.mrb[2].mxu0 }
 0x171   : > { %618 = shalt.err (!%p615_p5)
}
 0x172   : > { %s619_s29 = scalar_lea.hbm %s886_s7, 128  ;;  %s623_s18 = scalar_lea.hbm %s935_s2, 256 }
 0x173   : > { %p620_p9 = scmp.ne.s32.totalorder %s886_s7, %s619_s29  ;;  %p624_p7 = scmp.lt.u32.totalorder %s886_s7, %s935_s2 }
 0x174   : > { %p625_p3 = scmp.lt.u32.totalorder %s623_s18, %s619_s29  ;;  %p627_p4 = scmp.lt.u32.totalorder %s619_s29, %s886_s7 }
 0x175   : > { %p621_p1 = pnand %p620_p9, %p811_p10 }
 0x176   : > { %p626_p13 = por %p625_p3, %p624_p7 }
 0x177   : > { %p622_p2 = pneg %p621_p1 }
 0x178   : > { %p628_p6 = por %p627_p4, %p626_p13 }
 0x17a   : > { %p629_p8 = pnand %p628_p6, %p622_p2 }
 0x17c   : > { %632 = shalt.err (!%p629_p8)
}
 0x17d   : > { %468 = dma.vmem_to_hbm [thread:$0]  (%p811_p10), %s881_s21, 128, %s886_s7, %s305_s24   ;;  %v461_v13 = vpop.f32.mrb[3].mxu0 }
 0x17e PF: > { %s331_s16 = sand.u32 1, %s671_s9   ;;  %p953_p12 = scmp.ne.s32.totalorder %s943_s20, 0 }
 0x17f   : > { %p954_p11 = scmp.ge.s32.totalorder %s691_s14, 2  ;;  %s332_s17 = scalar_lea.sflag [#allocation4], %s331_s16 }
 0x181   : > { %p479_p0 = pnand %p954_p11, %p953_p12 }
 0x183   : > { %666 = dma.done.wait (!%p479_p0), %s332_s17, 128  }
 0x184   : > { %668 = vsyncadd (!%p479_p0), %s332_s17, 4294967168  ;;  %s19_s14 = sadd.s32 1, %s691_s14   ;;  %s955_s9 = smov %s675_s10 }
 0x185   : > { %p16_p5 = scmp.ge.s32.totalorder %s19_s14, 4   ;;  %s956_s10 = smov %s679_s11 }
 0x186   : > { %s957_s11 = smov %s820_s28  ;;  %s958_s12 = smov %s687_s13 }
 0x187   : > { %s959_s13 = smov %s961_s25  ;;  %18 = sbr.rel (!%p16_p5) target bundleno = 7 (0x7), region = 78 }
 0x18e   :  { %337 = vsyncpa [#allocation3], 1 }
 0x18f   :  { %339 = vsyncpa [#allocation3 + $0x1], 1 }
 0x190   :  { %340 = vsyncpa [#allocation6], 1 }
 0x191   :  { %341 = vsyncpa [#allocation4], 1 }
 0x192   :  { %343 = vsyncpa [#allocation4 + $0x1], 1 }

</bundles_post_ra>
